<compile_context>
chip_gen: v6e
topology: v6e:2x2x1
jax: 0.10.0
libtpu: 0.0.40
codegen_flags: <defaults>
</compile_context>

<pallas_src>
import functools

import jax
import jax.numpy as jnp
from jax.experimental import pallas as pl
from jax.experimental.pallas import tpu as pltpu

IMG_SIZE = 16
INPUT_SIZE = IMG_SIZE * IMG_SIZE          # 256
HIDDEN_SIZES = [128, 64]
BN_EPS = 1e-5


def _mlp_kernel(x_ref, w1_ref, b1_ref, w2_ref, b2_ref, w3_ref, b3_ref, out_ref):
    x = x_ref[...]                                                   # (TB, 256) bf16

    # Layer 1: Linear(256,128) + ReLU   (BN1 folded into W2/b2)
    h1 = jnp.maximum(
        jnp.dot(x, w1_ref[...], preferred_element_type=jnp.float32) + b1_ref[...],
        0.0)                                                         # (TB, 128) f32

    # Layer 2: Linear(128,64) + ReLU    (BN2 folded into W3/b3)
    h2 = jnp.maximum(
        jnp.dot(h1.astype(jnp.bfloat16), w2_ref[...],
                preferred_element_type=jnp.float32) + b2_ref[...],
        0.0)                                                         # (TB, 64) f32

    # Head: Linear(64,1) + Sigmoid, computed lane-dense.
    # w3_ref is (8, 64) bf16 with row 0 = folded w3 (rows 1..7 zero-padded);
    # NT matmul w3 @ h2^T gives an (8, TB) result -> take row 0 -> (1, TB).
    logits8 = jax.lax.dot_general(
        w3_ref[...], h2.astype(jnp.bfloat16),
        dimension_numbers=(((1,), (1,)), ((), ())),
        preferred_element_type=jnp.float32)                          # (8, TB)
    logits = logits8[0:1, :] + b3_ref[0]                             # (1, TB) f32
    out_ref[...] = (1.0 / (1.0 + jnp.exp(-logits))).astype(out_ref.dtype)


def _fold_bn(params):
    """Fold eval-mode BatchNorm (after ReLU) into the following Linear; cast
    matmul weights to bf16 (biases stay f32)."""
    s1 = params["g1"] * jax.lax.rsqrt(params["v1"] + BN_EPS)         # (1, 128)
    t1 = params["be1"] - params["m1"] * s1
    s2 = params["g2"] * jax.lax.rsqrt(params["v2"] + BN_EPS)         # (1, 64)
    t2 = params["be2"] - params["m2"] * s2

    w2f = params["w2"] * s1.reshape(-1, 1)                           # (128, 64)
    b2f = params["b2"] + t1 @ params["w2"]                           # (1, 64)

    w3_row = (params["w3"] * s2.reshape(-1, 1)).reshape(1, -1)       # (1, 64)
    w3f = jnp.pad(w3_row, ((0, 7), (0, 0)))                          # (8, 64)
    b3f = (params["b3"] + t2 @ params["w3"]).reshape(1)              # (1,) scalar

    return (params["w1"].astype(jnp.bfloat16), params["b1"].astype(jnp.float32),
            w2f.astype(jnp.bfloat16), b2f.astype(jnp.float32),
            w3f.astype(jnp.bfloat16), b3f.astype(jnp.float32))


def _round_up(n, m):
    return ((n + m - 1) // m) * m


@functools.partial(jax.jit, static_argnames=("tb_max",))
def net2_forward(x_nchw, params, *, tb_max=4096):
    """x_nchw: (B, 1, IMG, IMG) -> (B, 1) float32."""
    B = x_nchw.shape[0]
    x2d = x_nchw.reshape(B, -1).astype(jnp.bfloat16)                 # Flatten + bf16
    D = x2d.shape[1]

    # Batch tile: multiple of 128 (lane-dense (1, TB) output), capped at tb_max.
    TB = min(tb_max, _round_up(B, 128))
    nb = pl.cdiv(B, TB)
    if nb == 1 and TB > 128:
        # v7x: give both TensorCores at least one tile (no-op on v5e/v6e).
        TB = _round_up(pl.cdiv(B, 2), 128)
        nb = pl.cdiv(B, TB)
    B_out = nb * TB            # output width rounded up; x itself is NOT padded

    w1, b1, w2f, b2f, w3f, b3f = _fold_bn(params)
    H1, H2 = w1.shape[1], w2f.shape[1]

    weight_bytes = (D * H1 + H1 * H2 + 8 * H2) * 2 + (H1 + H2 + 1) * 4
    cost = pl.CostEstimate(
        flops=2 * B * (D * H1 + H1 * H2 + H2),
        transcendentals=B,
        bytes_accessed=B * D * 2 + weight_bytes + B_out * 4)

    # Scoped VMEM: double-buffered bf16 x tiles + f32/bf16 intermediates +
    # pinned weights + headroom. Stays within v5e's 16 MiB default at small TB
    # and well under v7x's 64 MiB physical per-core VMEM at TB=4096.
    vmem_limit = int(min(48 << 20, max(16 << 20, 8 * TB * D * 2 + (4 << 20))))

    out_row = pl.pallas_call(
        _mlp_kernel,
        out_shape=jax.ShapeDtypeStruct((1, B_out), jnp.float32),
        grid=(nb,),
        in_specs=[
            pl.BlockSpec((TB, D), lambda i: (i, 0)),      # x: streamed (ragged last tile OK)
            pl.BlockSpec((D, H1), lambda i: (0, 0)),      # w1 (bf16, pinned)
            pl.BlockSpec((1, H1), lambda i: (0, 0)),      # b1 (f32)
            pl.BlockSpec((H1, H2), lambda i: (0, 0)),     # w2 (BN1-folded, bf16)
            pl.BlockSpec((1, H2), lambda i: (0, 0)),      # b2 (BN1-folded, f32)
            pl.BlockSpec((8, H2), lambda i: (0, 0)),      # w3 row, padded to 8 sublanes
            pl.BlockSpec(memory_space=pltpu.MemorySpace.SMEM),  # b3 scalar
        ],
        out_specs=pl.BlockSpec((1, TB), lambda i: (0, i)),  # lane-dense row per tile
        compiler_params=pltpu.CompilerParams(
            dimension_semantics=("parallel",),
            vmem_limit_bytes=vmem_limit),
        cost_estimate=cost,
    )(x2d, w1, b1, w2f, b2f, w3f, b3f)

    return out_row[0, :B].reshape(B, 1)


def init_params(key):
    """Deterministic parameter init (same shapes as the PyTorch module)."""
    ks = jax.random.split(key, 6)
    d, h1, h2 = INPUT_SIZE, HIDDEN_SIZES[0], HIDDEN_SIZES[1]

    def lin(kw, kb, fan_in, fan_out):
        bound = 1.0 / jnp.sqrt(fan_in)
        # stored as (in, out) so kernel does x @ W (PyTorch stores (out, in))
        w = jax.random.uniform(kw, (fan_in, fan_out), jnp.float32, -bound, bound)
        b = jax.random.uniform(kb, (1, fan_out), jnp.float32, -bound, bound)
        return w, b

    w1, b1 = lin(ks[0], ks[1], d, h1)
    w2, b2 = lin(ks[2], ks[3], h1, h2)
    w3, b3 = lin(ks[4], ks[5], h2, 1)

    def bn(n, seed):
        k = jax.random.PRNGKey(seed)
        k1, k2, k3, k4 = jax.random.split(k, 4)
        return dict(
            gamma=1.0 + 0.1 * jax.random.normal(k1, (1, n), jnp.float32),
            beta=0.1 * jax.random.normal(k2, (1, n), jnp.float32),
            mean=0.1 * jax.random.normal(k3, (1, n), jnp.float32),
            var=jnp.abs(1.0 + 0.1 * jax.random.normal(k4, (1, n), jnp.float32)),
        )

    bn1, bn2 = bn(h1, 11), bn(h2, 22)
    return {
        "w1": w1, "b1": b1,
        "g1": bn1["gamma"], "be1": bn1["beta"], "m1": bn1["mean"], "v1": bn1["var"],
        "w2": w2, "b2": b2,
        "g2": bn2["gamma"], "be2": bn2["beta"], "m2": bn2["mean"], "v2": bn2["var"],
        "w3": w3, "b3": b3,
    }


def net2_reference(x_nchw, p):
    """Pure-JAX f32 reference (un-folded BN) for correctness checking."""
    x = x_nchw.reshape(x_nchw.shape[0], -1).astype(jnp.float32)
    h = jnp.maximum(x @ p["w1"] + p["b1"], 0.0)
    h = (h - p["m1"]) * p["g1"] / jnp.sqrt(p["v1"] + BN_EPS) + p["be1"]
    h = jnp.maximum(h @ p["w2"] + p["b2"], 0.0)
    h = (h - p["m2"]) * p["g2"] / jnp.sqrt(p["v2"] + BN_EPS) + p["be2"]
    return jax.nn.sigmoid(h @ p["w3"] + p["b3"])


if __name__ == "__main__":
    key = jax.random.PRNGKey(0)
    kx, kp = jax.random.split(key)

    x = jax.random.normal(kx, (2, 1, IMG_SIZE, IMG_SIZE), jnp.float32)  # NCHW
    params = init_params(kp)

    out = jax.block_until_ready(net2_forward(x, params))
    ref = net2_reference(x, params)

    assert out.shape == (2, 1), out.shape
    # bf16 streaming path: loosened tolerance (outputs are in (0,1)).
    assert jnp.allclose(out, ref, atol=1e-2, rtol=1e-2), (out, ref)

    print("KERNEL_OK")
</pallas_src>

<mosaic_0001>
module attributes {stable_mosaic.version = 11 : i64} {
  func.func @_mlp_kernel(%arg0: i32, %arg1: memref<128x256xbf16, #tpu.memory_space<vmem>>, %arg2: memref<256x128xbf16, #tpu.memory_space<vmem>>, %arg3: memref<1x128xf32, #tpu.memory_space<vmem>>, %arg4: memref<128x64xbf16, #tpu.memory_space<vmem>>, %arg5: memref<1x64xf32, #tpu.memory_space<vmem>>, %arg6: memref<8x64xbf16, #tpu.memory_space<vmem>>, %arg7: memref<1xf32, #tpu.memory_space<smem>>, %arg8: memref<1x128xf32, #tpu.memory_space<vmem>>) attributes {dimension_semantics = [#tpu.dimension_semantics<parallel>], iteration_bounds = array<i64: 1>, scalar_prefetch = 0 : i64, scratch_operands = 0 : i64, tpu.core_type = #tpu.core_type<tc>, window_params = [{transform_indices = @transform_0, window_bounds = array<i64: 128, 256>}, {pipeline_mode = #tpu.pipeline_mode<synchronous>, transform_indices = @transform_1, window_bounds = array<i64: 256, 128>}, {pipeline_mode = #tpu.pipeline_mode<synchronous>, transform_indices = @transform_2, window_bounds = array<i64: 1, 128>}, {pipeline_mode = #tpu.pipeline_mode<synchronous>, transform_indices = @transform_3, window_bounds = array<i64: 128, 64>}, {pipeline_mode = #tpu.pipeline_mode<synchronous>, transform_indices = @transform_4, window_bounds = array<i64: 1, 64>}, {pipeline_mode = #tpu.pipeline_mode<synchronous>, transform_indices = @transform_5, window_bounds = array<i64: 8, 64>}, {transform_indices = @transform_6, window_bounds = array<i64: 1>}, {transform_indices = @transform_7, window_bounds = array<i64: 1, 128>}]} {
    %c0 = arith.constant 0 : index
    %c0_0 = arith.constant 0 : index
    %0 = vector.load %arg1[%c0, %c0_0] : memref<128x256xbf16, #tpu.memory_space<vmem>>, vector<128x256xbf16>
    %c0_1 = arith.constant 0 : index
    %c0_2 = arith.constant 0 : index
    %1 = vector.load %arg2[%c0_1, %c0_2] : memref<256x128xbf16, #tpu.memory_space<vmem>>, vector<256x128xbf16>
    %cst = arith.constant dense<0.000000e+00> : vector<128x128xf32>
    %2 = tpu.matmul %0, %1, %cst {dimension_numbers = #tpu.dot_dimension_numbers<[1], [0], [0], [1], [0, 0, 1, 1], [], []>} : vector<128x256xbf16>, vector<256x128xbf16>, vector<128x128xf32> -> vector<128x128xf32>
    %c0_3 = arith.constant 0 : index
    %c0_4 = arith.constant 0 : index
    %3 = vector.load %arg3[%c0_3, %c0_4] : memref<1x128xf32, #tpu.memory_space<vmem>>, vector<1x128xf32>
    %4 = vector.broadcast %3 : vector<1x128xf32> to vector<128x128xf32>
    %5 = arith.addf %2, %4 : vector<128x128xf32>
    %cst_5 = arith.constant 0.000000e+00 : f32
    %6 = vector.broadcast %cst_5 : f32 to vector<128x128xf32>
    %7 = arith.maximumf %5, %6 : vector<128x128xf32>
    %8 = arith.truncf %7 : vector<128x128xf32> to vector<128x128xbf16>
    %c0_6 = arith.constant 0 : index
    %c0_7 = arith.constant 0 : index
    %9 = vector.load %arg4[%c0_6, %c0_7] : memref<128x64xbf16, #tpu.memory_space<vmem>>, vector<128x64xbf16>
    %cst_8 = arith.constant dense<0.000000e+00> : vector<128x64xf32>
    %10 = tpu.matmul %8, %9, %cst_8 {dimension_numbers = #tpu.dot_dimension_numbers<[1], [0], [0], [1], [0, 0, 1, 1], [], []>} : vector<128x128xbf16>, vector<128x64xbf16>, vector<128x64xf32> -> vector<128x64xf32>
    %c0_9 = arith.constant 0 : index
    %c0_10 = arith.constant 0 : index
    %11 = vector.load %arg5[%c0_9, %c0_10] : memref<1x64xf32, #tpu.memory_space<vmem>>, vector<1x64xf32>
    %12 = vector.broadcast %11 : vector<1x64xf32> to vector<128x64xf32>
    %13 = arith.addf %10, %12 : vector<128x64xf32>
    %cst_11 = arith.constant 0.000000e+00 : f32
    %14 = vector.broadcast %cst_11 : f32 to vector<128x64xf32>
    %15 = arith.maximumf %13, %14 : vector<128x64xf32>
    %c0_12 = arith.constant 0 : index
    %c0_13 = arith.constant 0 : index
    %16 = vector.load %arg6[%c0_12, %c0_13] : memref<8x64xbf16, #tpu.memory_space<vmem>>, vector<8x64xbf16>
    %17 = arith.truncf %15 : vector<128x64xf32> to vector<128x64xbf16>
    %cst_14 = arith.constant dense<0.000000e+00> : vector<8x128xf32>
    %18 = tpu.matmul %16, %17, %cst_14 {dimension_numbers = #tpu.dot_dimension_numbers<[1], [1], [0], [0], [0, 0, 1, 0], [], []>} : vector<8x64xbf16>, vector<128x64xbf16>, vector<8x128xf32> -> vector<8x128xf32>
    %19 = vector.extract_strided_slice %18 {offsets = [0, 0], sizes = [1, 128], strides = [1, 1]} : vector<8x128xf32> to vector<1x128xf32>
    %c0_15 = arith.constant 0 : index
    %20 = memref.load %arg7[%c0_15] : memref<1xf32, #tpu.memory_space<smem>>
    %21 = vector.broadcast %20 : f32 to vector<1x128xf32>
    %22 = arith.addf %19, %21 : vector<1x128xf32>
    %cst_16 = arith.constant 0.000000e+00 : f32
    %23 = vector.broadcast %cst_16 : f32 to vector<1x128xf32>
    %24 = arith.subf %23, %22 : vector<1x128xf32>
    %25 = math.exp %24 : vector<1x128xf32>
    %cst_17 = arith.constant 1.000000e+00 : f32
    %26 = vector.broadcast %cst_17 : f32 to vector<1x128xf32>
    %27 = arith.addf %26, %25 : vector<1x128xf32>
    %cst_18 = arith.constant 1.000000e+00 : f32
    %28 = vector.broadcast %cst_18 : f32 to vector<1x128xf32>
    %29 = arith.divf %28, %27 : vector<1x128xf32>
    %c0_19 = arith.constant 0 : index
    %c0_20 = arith.constant 0 : index
    %30 = vector.load %arg8[%c0_19, %c0_20] : memref<1x128xf32, #tpu.memory_space<vmem>>, vector<1x128xf32>
    tpu.vector_store %arg8[%c0_19, %c0_20], %29 {strides = array<i32>} : memref<1x128xf32, #tpu.memory_space<vmem>>, vector<1x128xf32>,
    return
  }
  func.func @transform_0(%arg0: i32) -> (i32, i32) {
    %c0_i32 = arith.constant 0 : i32
    %c0_i32_0 = arith.constant 0 : i32
    return %arg0, %c0_i32 : i32, i32
  }
  func.func @transform_1(%arg0: i32) -> (i32, i32) {
    %c0_i32 = arith.constant 0 : i32
    %c0_i32_0 = arith.constant 0 : i32
    %c0_i32_1 = arith.constant 0 : i32
    return %c0_i32, %c0_i32_0 : i32, i32
  }
  func.func @transform_2(%arg0: i32) -> (i32, i32) {
    %c0_i32 = arith.constant 0 : i32
    %c0_i32_0 = arith.constant 0 : i32
    %c0_i32_1 = arith.constant 0 : i32
    return %c0_i32, %c0_i32_0 : i32, i32
  }
  func.func @transform_3(%arg0: i32) -> (i32, i32) {
    %c0_i32 = arith.constant 0 : i32
    %c0_i32_0 = arith.constant 0 : i32
    %c0_i32_1 = arith.constant 0 : i32
    return %c0_i32, %c0_i32_0 : i32, i32
  }
  func.func @transform_4(%arg0: i32) -> (i32, i32) {
    %c0_i32 = arith.constant 0 : i32
    %c0_i32_0 = arith.constant 0 : i32
    %c0_i32_1 = arith.constant 0 : i32
    return %c0_i32, %c0_i32_0 : i32, i32
  }
  func.func @transform_5(%arg0: i32) -> (i32, i32) {
    %c0_i32 = arith.constant 0 : i32
    %c0_i32_0 = arith.constant 0 : i32
    %c0_i32_1 = arith.constant 0 : i32
    return %c0_i32, %c0_i32_0 : i32, i32
  }
  func.func @transform_6(%arg0: i32) -> i32 {
    %c0_i32 = arith.constant 0 : i32
    %c0_i32_0 = arith.constant 0 : i32
    return %c0_i32 : i32
  }
  func.func @transform_7(%arg0: i32) -> (i32, i32) {
    %c0_i32 = arith.constant 0 : i32
    %c0_i32_0 = arith.constant 0 : i32
    return %c0_i32, %arg0 : i32, i32
  }
}

</mosaic_0001>

<bundles_post_ra>
// kernel: net2_forward.1
= control target key start
LH: loop header
LB: loop body
LE: loop exit
PB: predicated region body
PF: predicated region fallthrough
CT: control target
= control target key end

     0   :  { %v1430_v6 = vmov 1966171168   ;;  %v202_v8 = vlaneseq  ;;  %vm1432_vm0 = vmmov 0   ;;  %vm1149_vm1 = vcmask 523264   ;;  %s1882_s1 = inlined_call_operand.vmem [shape: bf16[256,128], index: 1, kind: input, shape index: {}]   ;;  %s1883_s0 = inlined_call_operand.vmem [shape: bf16[2,256], index: 0, kind: input, shape index: {}]   ;;  %s1884_s3 = inlined_call_operand.vmem [shape: bf16[128,64], index: 3, kind: input, shape index: {}]   ;;  %s1885_s2 = inlined_call_operand.vmem [shape: f32[1,128], index: 2, kind: input, shape index: {}]   ;;  %s1886_s4 = inlined_call_operand.vmem [shape: f32[1,64], index: 4, kind: input, shape index: {}]   ;;  %s1887_s5 = inlined_call_operand.vmem [shape: bf16[8,64], index: 5, kind: input, shape index: {}]   ;;  %s1888_s6 = inlined_call_operand.<no memory space> [shape: f32[1], index: 6, kind: input, shape index: {}]   ;;  %s1889_s7 = inlined_call_operand.vmem [shape: f32[1,128], index: 7, kind: output, shape index: {}]  }
   0x1   :  { %v1402_v0 = vld [vmem:[%s1882_s1 + $0x78] sm:$0xff]   ;;  %v1404_v2 = vld [vmem:[%s1882_s1 + $0x70] sm:$0xff]   ;;  %v1406_v4 = vld [vmem:[%s1882_s1 + $0x68] sm:$0xff]   ;;  %v200_v7 = vunpack.c.l.s4 %v1430_v6 }
   0x2   :  { %v1403_v1 = vld [vmem:[%s1882_s1 + $0x38] sm:$0xff]   ;;  %1258 = vmatprep.subr.bf16.mxu0 %v1402_v0  ;;  %v1405_v3 = vld [vmem:[%s1882_s1 + $0x30] sm:$0xff]   ;;  %v1407_v5 = vld [vmem:[%s1882_s1 + $0x28] sm:$0xff]   ;;  %v203_v12 = vshrl.u32 %v202_v8, 7 }
   0x3   :  { %1259 = vmatpush3.bf16.msra.mxu0 %v1403_v1  ;;  %v1408_v9 = vld [vmem:[%s1882_s1 + $0x60] sm:$0xff]   ;;  %v201_v11 = vunpack.c.0.s8 %v200_v7  ;;  %v1410_v13 = vld [vmem:[%s1882_s1 + $0x58] sm:$0xff]   ;;  %v1412_v15 = vld [vmem:[%s1882_s1 + $0x50] sm:$0xff]  }
   0x4   :  { %1260 = vmatprep.subr.bf16.mxu0 %v1404_v2  ;;  %v1409_v10 = vld [vmem:[%s1882_s1 + $0x20] sm:$0xff]   ;;  %v1411_v14 = vld [vmem:[%s1882_s1 + $0x18] sm:$0xff]   ;;  %v1413_v20 = vld [vmem:[%s1882_s1 + $0x10] sm:$0xff]  }
   0x5   :  { %v1506_v16 = vsub.s32 %v201_v11, %v203_v12  ;;  %v28_v17 = vld [vmem:[%s1883_s0] sm:$0x3]  ;;  %v29_v18 = vld [vmem:[%s1883_s0 + $0x2] sm:$0x3]  ;;  %v30_v19 = vld [vmem:[%s1883_s0 + $0x4] sm:$0x3] }
   0x6   :  { %v31_v21 = vld [vmem:[%s1883_s0 + $0x6] sm:$0x3]  ;;  %v32_v22 = vld [vmem:[%s1883_s0 + $0x8] sm:$0x3]  ;;  %v33_v23 = vld [vmem:[%s1883_s0 + $0xa] sm:$0x3]  ;;  %v195_v24 = vcombine.low %v28_v17, %v29_v18 }
   0x7   :  { %1261 = vmatpush3.bf16.msra.mxu0 %v1405_v3  ;;  %v1414_v25 = vld [vmem:[%s1882_s1 + $0x48] sm:$0xff]   ;;  %v196_v28 = vcombine.low %v30_v19, %v31_v21  ;;  %v197_v29 = vcombine.low %v32_v22, %v33_v23  ;;  %v36_v30 = vld [vmem:[%s1883_s0 + $0x10] sm:$0x3]  ;;  %v37_v33 = vld [vmem:[%s1883_s0 + $0x12] sm:$0x3] }
   0x8   :  { %1262 = vmatprep.subr.bf16.mxu0 %v1406_v4  ;;  %v34_v26 = vld [vmem:[%s1883_s0 + $0xc] sm:$0x3]  ;;  %v35_v27 = vld [vmem:[%s1883_s0 + $0xe] sm:$0x3]  ;;  %v205_v32 = vrot.slane %v195_v24, %v1506_v16  ;;  %v38_v34 = vld [vmem:[%s1883_s0 + $0x14] sm:$0x3]  ;;  %v261_v41 = vcombine.low %v36_v30, %v37_v33 }
   0x9   :  { %v198_v31 = vcombine.low %v34_v26, %v35_v27  ;;  %v39_v35 = vld [vmem:[%s1883_s0 + $0x16] sm:$0x3]  ;;  %v212_v36 = vrot.slane %v196_v28, %v1506_v16  ;;  %v219_v37 = vrot.slane %v197_v29, %v1506_v16  ;;  %v40_v38 = vld [vmem:[%s1883_s0 + $0x18] sm:$0x3]  ;;  %v41_v39 = vld [vmem:[%s1883_s0 + $0x1a] sm:$0x3] }
   0xa   :  { %v42_v40 = vld [vmem:[%s1883_s0 + $0x1c] sm:$0x3]  ;;  %v262_v42 = vcombine.low %v38_v34, %v39_v35  ;;  %v43_v44 = vld [vmem:[%s1883_s0 + $0x1e] sm:$0x3]  ;;  %v263_v45 = vcombine.low %v40_v38, %v41_v39  ;;  %v44_v46 = vld [vmem:[%s1883_s0 + $0x20] sm:$0x3]  ;;  %v271_v52 = vrot.slane %v261_v41, %v1506_v16 }
   0xb   :  { %1263 = vmatpush3.bf16.msra.mxu0 %v1407_v5  ;;  %v226_v43 = vrot.slane %v198_v31, %v1506_v16  ;;  %v45_v47 = vld [vmem:[%s1883_s0 + $0x22] sm:$0x3]  ;;  %v1415_v48 = vld [vmem:[%s1882_s1 + $0x8] sm:$0xff]   ;;  %v228_v49 = vcombine.high %v205_v32, %v212_v36  ;;  %v227_v50 = vcombine.low %v205_v32, %v212_v36  ;;  %v264_v51 = vcombine.low %v42_v40, %v43_v44  ;;  %v46_v53 = vld [vmem:[%s1883_s0 + $0x24] sm:$0x3] }
   0xc   :  { %1264 = vmatprep.subr.bf16.mxu0 %v1408_v9  ;;  %v278_v56 = vrot.slane %v262_v42, %v1506_v16  ;;  %v285_v57 = vrot.slane %v263_v45, %v1506_v16  ;;  %v47_v58 = vld [vmem:[%s1883_s0 + $0x26] sm:$0x3]  ;;  %v48_v59 = vld [vmem:[%s1883_s0 + $0x28] sm:$0x3]  ;;  %v49_v60 = vld [vmem:[%s1883_s0 + $0x2a] sm:$0x3]  ;;  %v327_v0 = vcombine.low %v44_v46, %v45_v47 }
   0xd   :  { %v230_v54 = vcombine.high %v219_v37, %v226_v43  ;;  %v229_v55 = vcombine.low %v219_v37, %v226_v43  ;;  %v1416_v61 = vld [vmem:[%s1882_s1 + $0x40] sm:$0xff]   ;;  %v244_v62 = vrot.slane %v228_v49, %v1506_v16  ;;  %v292_v63 = vrot.slane %v264_v51, %v1506_v16  ;;  %v50_v6 = vld [vmem:[%s1883_s0 + $0x2c] sm:$0x3]  ;;  %v51_v7 = vld [vmem:[%s1883_s0 + $0x2e] sm:$0x3] }
   0xe   :  { %v1417_v1 = vld [vmem:[%s1882_s1] sm:$0xff]   ;;  %v237_v3 = vrot.slane %v227_v50, %v1506_v16  ;;  %v294_v5 = vcombine.high %v271_v52, %v278_v56  ;;  %v328_v9 = vcombine.low %v46_v53, %v47_v58  ;;  %v52_v11 = vld [vmem:[%s1883_s0 + $0x30] sm:$0x3]  ;;  %v53_v12 = vld [vmem:[%s1883_s0 + $0x32] sm:$0x3]  ;;  %v293_v21 = vcombine.low %v271_v52, %v278_v56 }
   0xf   :  { %1265 = vmatpush3.bf16.msra.mxu0 %v1409_v10  ;;  %v258_v2 = vrot.slane %v230_v54, %v1506_v16  ;;  %v251_v4 = vrot.slane %v229_v55, %v1506_v16  ;;  %v296_v8 = vcombine.high %v285_v57, %v292_v63  ;;  %v329_v10 = vcombine.low %v48_v59, %v49_v60  ;;  %v55_v17 = vld [vmem:[%s1883_s0 + $0x36] sm:$0x3]  ;;  %v56_v18 = vld [vmem:[%s1883_s0 + $0x38] sm:$0x3]  ;;  %v57_v19 = vld [vmem:[%s1883_s0 + $0x3a] sm:$0x3] }
  0x10   :  { %1266 = vmatprep.subr.bf16.mxu0 %v1410_v13  ;;  %v54_v13 = vld [vmem:[%s1883_s0 + $0x34] sm:$0x3]  ;;  %v330_v22 = vcombine.low %v50_v6, %v51_v7  ;;  %v337_v23 = vrot.slane %v327_v0, %v1506_v16  ;;  %v58_v24 = vld [vmem:[%s1883_s0 + $0x3c] sm:$0x3]  ;;  %v295_v27 = vcombine.low %v285_v57, %v292_v63  ;;  %v344_v28 = vrot.slane %v328_v9, %v1506_v16  ;;  %v60_v44 = vld [vmem:[%s1883_s0 + $0x40] sm:$0x3] }
  0x11   :  { %v259_v26 = vcombine.low %v237_v3, %v251_v4  ;;  %v351_v29 = vrot.slane %v329_v10, %v1506_v16  ;;  %v393_v31 = vcombine.low %v52_v11, %v53_v12  ;;  %v394_v32 = vcombine.low %v54_v13, %v55_v17  ;;  %v61_v45 = vld [vmem:[%s1883_s0 + $0x42] sm:$0x3]  ;;  %v63_v49 = vld [vmem:[%s1883_s0 + $0x46] sm:$0x3]  ;;  %v64_v50 = vld [vmem:[%s1883_s0 + $0x48] sm:$0x3] }
  0x12   :  { %v358_v30 = vrot.slane %v330_v22, %v1506_v16  ;;  %v395_v33 = vcombine.low %v56_v18, %v57_v19  ;;  %v360_v35 = vcombine.high %v337_v23, %v344_v28  ;;  %v303_v38 = vrot.slane %v293_v21, %v1506_v16  ;;  %v65_v51 = vld [vmem:[%s1883_s0 + $0x4a] sm:$0x3]  ;;  %v66_v52 = vld [vmem:[%s1883_s0 + $0x4c] sm:$0x3]  ;;  %v67_v53 = vld [vmem:[%s1883_s0 + $0x4e] sm:$0x3] }
  0x13   :  { %1267 = vmatpush3.bf16.msra.mxu0 %v1411_v14  ;;  %v260_v14 = vcombine.low %v244_v62, %v258_v2  ;;  %v317_v39 = vrot.slane %v295_v27, %v1506_v16  ;;  %v1640_v40 = vrot.slane %v393_v31, %v1506_v16  ;;  %v410_v41 = vrot.slane %v394_v32, %v1506_v16  ;;  %v1418_v60 = vld [vmem:[%s1884_s3 + $0x38] sm:$0xff]   ;;  %v1420_v2 = vld [vmem:[%s1884_s3 + $0x28] sm:$0xff]   ;;  %v69_v6 = vld [vmem:[%s1883_s0 + $0x52] sm:$0x3] }
  0x14   :  { %1268 = vmatprep.subr.bf16.mxu0 %v1412_v15  ;;  %v310_v15 = vrot.slane %v294_v5, %v1506_v16  ;;  %v362_v37 = vcombine.high %v351_v29, %v358_v30  ;;  %v417_v42 = vrot.slane %v395_v33, %v1506_v16  ;;  %v376_v46 = vrot.slane %v360_v35, %v1506_v16  ;;  %v68_v5 = vld [vmem:[%s1883_s0 + $0x50] sm:$0x3]  ;;  %v70_v7 = vld [vmem:[%s1883_s0 + $0x54] sm:$0x3]  ;;  %v72_v9 = vld [vmem:[%s1883_s0 + $0x58] sm:$0x3] }
  0x15   :  { %867 = vmatprep.mubr.bf16.mxu0 %v260_v14  ;;  %v359_v54 = vcombine.low %v337_v23, %v344_v28  ;;  %v361_v55 = vcombine.low %v351_v29, %v358_v30  ;;  %v325_v56 = vcombine.low %v303_v38, %v317_v39  ;;  %v426_v57 = vcombine.high %v1640_v40, %v410_v41  ;;  %v73_v10 = vld [vmem:[%s1883_s0 + $0x5a] sm:$0x3]  ;;  %v74_v11 = vld [vmem:[%s1883_s0 + $0x5c] sm:$0x3]  ;;  %v75_v19 = vld [vmem:[%s1883_s0 + $0x5e] sm:$0x3] }
  0x16   :  { %v390_v47 = vrot.slane %v362_v37, %v1506_v16  ;;  %v459_v59 = vcombine.low %v60_v44, %v61_v45  ;;  %v461_v63 = vcombine.low %v64_v50, %v65_v51  ;;  %v462_v0 = vcombine.low %v66_v52, %v67_v53  ;;  %1347 = vmatprep.subr.bf16.mxu1 %v1418_v60  ;;  %v77_v37 = vld [vmem:[%s1883_s0 + $0x62] sm:$0x3]  ;;  %v82_v44 = vld [vmem:[%s1883_s0 + $0x6c] sm:$0x3]  ;;  %v83_v45 = vld [vmem:[%s1883_s0 + $0x6e] sm:$0x3] }
  0x17   :  { %1269 = vmatpush3.bf16.msra.mxu0 %v1413_v20  ;;  %v324_v20 = vrot.slane %v296_v8, %v1506_v16  ;;  %v369_v3 = vrot.slane %v359_v54, %v1506_v16  ;;  %v383_v4 = vrot.slane %v361_v55, %v1506_v16  ;;  %v71_v8 = vld [vmem:[%s1883_s0 + $0x56] sm:$0x3]  ;;  %1348 = vmatpush3.bf16.msra.mxu1 %v1418_v60  ;;  %v84_v60 = vld [vmem:[%s1883_s0 + $0x70] sm:$0x3] }
  0x18   :  { %1270 = vmatprep.subr.bf16.mxu0 %v1414_v25  ;;  %v59_v25 = vld [vmem:[%s1883_s0 + $0x3e] sm:$0x3]  ;;  %v442_v12 = vrot.slane %v426_v57, %v1506_v16  ;;  %v469_v14 = vrot.slane %v459_v59, %v1506_v16  ;;  %v483_v17 = vrot.slane %v461_v63, %v1506_v16  ;;  %v490_v18 = vrot.slane %v462_v0, %v1506_v16 }
  0x19   :  { %v326_v34 = vcombine.low %v310_v15, %v324_v20  ;;  %v396_v36 = vcombine.low %v58_v24, %v59_v25  ;;  %v391_v20 = vcombine.low %v369_v3, %v383_v4  ;;  %v425_v21 = vcombine.low %v1640_v40, %v410_v41  ;;  %v78_v40 = vld [vmem:[%s1883_s0 + $0x64] sm:$0x3]  ;;  %v79_v41 = vld [vmem:[%s1883_s0 + $0x66] sm:$0x3]  ;;  %v87_v3 = vld [vmem:[%s1883_s0 + $0x76] sm:$0x3] }
  0x1a   :  { %v525_v23 = vcombine.low %v68_v5, %v69_v6  ;;  %v526_v24 = vcombine.low %v70_v7, %v71_v8  ;;  %v527_v25 = vcombine.low %v72_v9, %v73_v10  ;;  %v494_v29 = vcombine.high %v483_v17, %v490_v18  ;;  %v88_v4 = vld [vmem:[%s1883_s0 + $0x78] sm:$0x3]  ;;  %v89_v5 = vld [vmem:[%s1883_s0 + $0x7a] sm:$0x3]  ;;  %v90_v6 = vld [vmem:[%s1883_s0 + $0x7c] sm:$0x3] }
  0x1b   :  { %1271 = vmatpush3.bf16.msra.mxu0 %v1415_v48  ;;  %v424_v43 = vrot.slane %v396_v36, %v1506_v16  ;;  %v62_v48 = vld [vmem:[%s1883_s0 + $0x44] sm:$0x3]  ;;  %v435_v30 = vrot.slane %v425_v21, %v1506_v16  ;;  %v76_v36 = vld [vmem:[%s1883_s0 + $0x60] sm:$0x3]  ;;  %v592_v53 = vcombine.low %v78_v40, %v79_v41  ;;  %v594_v55 = vcombine.low %v82_v44, %v83_v45  ;;  %v91_v7 = vld [vmem:[%s1883_s0 + $0x7e] sm:$0x3] }
  0x1c   :  { %1272 = vmatprep.subr.bf16.mxu0 %v1416_v61  ;;  %v392_v61 = vcombine.low %v376_v46, %v390_v47  ;;  %v460_v62 = vcombine.low %v62_v48, %v63_v49  ;;  %v535_v32 = vrot.slane %v525_v23, %v1506_v16  ;;  %v542_v33 = vrot.slane %v526_v24, %v1506_v16  ;;  %v1421_v44 = vld [vmem:[%s1884_s3 + $0x20] sm:$0xff]   ;;  %v1422_v45 = vld [vmem:[%s1884_s3 + $0x18] sm:$0xff]  }
  0x1d   :  { %v428_v58 = vcombine.high %v417_v42, %v424_v43  ;;  %v427_v22 = vcombine.low %v417_v42, %v424_v43  ;;  %v522_v39 = vrot.slane %v494_v29, %v1506_v16  ;;  %v80_v42 = vld [vmem:[%s1883_s0 + $0x68] sm:$0x3]  ;;  %v81_v43 = vld [vmem:[%s1883_s0 + $0x6a] sm:$0x3]  ;;  %v493_v48 = vcombine.low %v483_v17, %v490_v18 }
  0x1e   :  { %v476_v15 = vrot.slane %v460_v62, %v1506_v16  ;;  %v558_v49 = vcombine.high %v535_v32, %v542_v33  ;;  %v591_v51 = vcombine.low %v76_v36, %v77_v37  ;;  %v593_v54 = vcombine.low %v80_v42, %v81_v43 }
  0x1f   :  { %1273 = vmatpush3.bf16.msra.mxu0 %v1417_v1  ;;  %v1419_v1 = vld [vmem:[%s1884_s3 + $0x30] sm:$0xff]   ;;  %v456_v13 = vrot.slane %v428_v58, %v1506_v16  ;;  %v449_v31 = vrot.slane %v427_v22, %v1506_v16  ;;  %v515_v57 = vrot.slane %v493_v48, %v1506_v16  ;;  %v608_v63 = vrot.slane %v592_v53, %v1506_v16 }
  0x20   :  { %1349 = vmatprep.subr.bf16.mxu1 %v1419_v1  ;;  %v492_v28 = vcombine.high %v469_v14, %v476_v15  ;;  %v491_v47 = vcombine.low %v469_v14, %v476_v15  ;;  %v574_v58 = vrot.slane %v558_v49, %v1506_v16  ;;  %v601_v62 = vrot.slane %v591_v51, %v1506_v16 }
  0x21   :  { %1350 = vmatpush3.bf16.msra.mxu1 %v1419_v1  ;;  %v458_v27 = vcombine.low %v442_v12, %v456_v13  ;;  %v457_v46 = vcombine.low %v435_v30, %v449_v31  ;;  %v615_v0 = vrot.slane %v593_v54, %v1506_v16  ;;  %v622_v1 = vrot.slane %v594_v55, %v1506_v16 }
  0x22   :  { %868 = vmatmul.mubr.bf16.vlgmr.msra.gmra.mxu0 %v259_v26  ;;  %v528_v26 = vcombine.low %v74_v11, %v75_v19  ;;  %1351 = vmatprep.subr.bf16.mxu1 %v1420_v2  ;;  %v508_v38 = vrot.slane %v492_v28, %v1506_v16  ;;  %v557_v8 = vcombine.low %v535_v32, %v542_v33 }
  0x23   :  { %875 = vmatprep.mubr.bf16.mxu0 %v326_v34  ;;  %v549_v34 = vrot.slane %v527_v25, %v1506_v16  ;;  %v624_v14 = vcombine.high %v601_v62, %v608_v63  ;;  %v626_v15 = vcombine.high %v615_v0, %v622_v1  ;;  %v659_v17 = vcombine.low %v88_v4, %v89_v5 }
  0x24   :  { %v556_v35 = vrot.slane %v528_v26, %v1506_v16  ;;  %v524_v52 = vcombine.low %v508_v38, %v522_v39  ;;  %v660_v18 = vcombine.low %v90_v6, %v91_v7  ;;  %v567_v19 = vrot.slane %v557_v8, %v1506_v16 }
  0x25   :  { %1352 = vmatpush3.bf16.msra.mxu1 %v1420_v2  ;;  %v86_v2 = vld [vmem:[%s1883_s0 + $0x74] sm:$0x3]  ;;  %v640_v23 = vrot.slane %v624_v14, %v1506_v16  ;;  %v654_v24 = vrot.slane %v626_v15, %v1506_v16  ;;  %v681_v25 = vrot.slane %v659_v17, %v1506_v16  ;;  %v623_v28 = vcombine.low %v601_v62, %v608_v63 }
  0x26   :  { %v560_v50 = vcombine.high %v549_v34, %v556_v35  ;;  %v559_v9 = vcombine.low %v549_v34, %v556_v35  ;;  %v658_v13 = vcombine.low %v86_v2, %v87_v3  ;;  %v688_v26 = vrot.slane %v660_v18, %v1506_v16  ;;  %1353 = vmatprep.subr.bf16.mxu1 %v1421_v44 }
  0x27   :  { %v625_v29 = vcombine.low %v615_v0, %v622_v1  ;;  %v656_v30 = vcombine.low %v640_v23, %v654_v24  ;;  %v633_v33 = vrot.slane %v623_v28, %v1506_v16 }
  0x28   :  { %v588_v59 = vrot.slane %v560_v50, %v1506_v16  ;;  %v674_v22 = vrot.slane %v658_v13, %v1506_v16  ;;  %v692_v32 = vcombine.high %v681_v25, %v688_v26  ;;  %v691_v39 = vcombine.low %v681_v25, %v688_v26 }
  0x29   :  { %v647_v34 = vrot.slane %v625_v29, %v1506_v16  ;;  %1354 = vmatpush3.bf16.msra.mxu1 %v1421_v44 }
  0x2a   :  { %876 = vmatmul.mubr.bf16.gmra.mxu0 %v325_v56  ;;  %v501_v56 = vrot.slane %v491_v47, %v1506_v16  ;;  %v590_v11 = vcombine.low %v574_v58, %v588_v59  ;;  %v720_v36 = vrot.slane %v692_v32, %v1506_v16  ;;  %v713_v42 = vrot.slane %v691_v39, %v1506_v16  ;;  %v1425_v47 = vld [vmem:[%s1884_s3] sm:$0xff]  }
  0x2b   :  { %883 = vmatprep.mubr.bf16.mxu0 %v392_v61  ;;  %v85_v61 = vld [vmem:[%s1883_s0 + $0x72] sm:$0x3]  ;;  %v655_v37 = vcombine.low %v633_v33, %v647_v34  ;;  %1355 = vmatprep.subr.bf16.mxu1 %v1422_v45 }
  0x2c   :  { %v523_v10 = vcombine.low %v501_v56, %v515_v57  ;;  %v657_v12 = vcombine.low %v84_v60, %v85_v61 }
  0x2d   :  { %1356 = vmatpush3.bf16.msra.mxu1 %v1422_v45 }
  0x2e   :  { %v667_v21 = vrot.slane %v657_v12, %v1506_v16 }
  0x30   :  { %v690_v31 = vcombine.high %v667_v21, %v674_v22  ;;  %v689_v38 = vcombine.low %v667_v21, %v674_v22 }
  0x32   :  { %884 = vmatmul.mubr.bf16.gmra.mxu0 %v391_v20  ;;  %v581_v20 = vrot.slane %v559_v9, %v1506_v16  ;;  %v706_v35 = vrot.slane %v690_v31, %v1506_v16  ;;  %v699_v41 = vrot.slane %v689_v38, %v1506_v16  ;;  %v1424_v16 = vld [vmem:[%s1884_s3 + $0x8] sm:$0xff]  }
  0x33   :  { %891 = vmatprep.mubr.bf16.mxu0 %v458_v27 }
  0x34   :  { %v589_v27 = vcombine.low %v567_v19, %v581_v20  ;;  %v722_v40 = vcombine.low %v706_v35, %v720_v36  ;;  %v721_v43 = vcombine.low %v699_v41, %v713_v42 }
  0x3a   :  { %892 = vmatmul.mubr.bf16.gmra.mxu0 %v457_v46  ;;  %v1423_v46 = vld [vmem:[%s1884_s3 + $0x10] sm:$0xff]  }
  0x3b   :  { %899 = vmatprep.mubr.bf16.mxu0 %v524_v52  ;;  %1357 = vmatprep.subr.bf16.mxu1 %v1423_v46  ;;  %v1810_v52 = vld [vmem:[%s1885_s2] ss:$0 sm:$0xff] }
  0x3c   :  { %1358 = vmatpush3.bf16.msra.mxu1 %v1423_v46 }
  0x3d   :  { %1359 = vmatprep.subr.bf16.mxu1 %v1424_v16 }
  0x40   :  { %1360 = vmatpush3.bf16.msra.mxu1 %v1424_v16 }
  0x41   :  { %1361 = vmatprep.subr.bf16.mxu1 %v1425_v47 }
  0x42   :  { %900 = vmatmul.mubr.bf16.gmra.mxu0 %v523_v10 }
  0x43   :  { %907 = vmatprep.mubr.bf16.mxu0 %v590_v11 }
  0x44   :  { %1362 = vmatpush3.bf16.msra.mxu1 %v1425_v47 }
  0x4a   :  { %908 = vmatmul.mubr.bf16.gmra.mxu0 %v589_v27 }
  0x4b   :  { %915 = vmatprep.mubr.bf16.mxu0 %v656_v30 }
  0x52   :  { %916 = vmatmul.mubr.bf16.gmra.mxu0 %v655_v37 }
  0x53   :  { %923 = vmatprep.mubr.bf16.mxu0 %v722_v40 }
  0x5a   :  { %924 = vmatmul.mubr.bf16.gmra.mxu0 %v721_v43 }
  0xe2   :  { %v1274_v48 = vpop.f32.mrf.mxu0 }
  0xe4   :  { %v1275_v49 = vpop.f32.mrf.mxu0 }
  0xe5   :  { %v1276_v50 = vadd.f32 %v1275_v49, %v1274_v48 }
  0xe6   :  { %v1277_v51 = vpop.f32.mrf.mxu0 }
  0xe7   :  { %v870_v55 = vadd.f32 %v1276_v50, %v1810_v52 }
  0xe8   :  { %v1278_v53 = vpop.f32.mrf.mxu0 }
  0xe9   :  { %v1279_v54 = vadd.f32 %v1278_v53, %v1277_v51  ;;  %v932_v60 = vmax.f32 %v870_v55, 0.0 }
  0xea   :  { %v1280_v56 = vpop.f32.mrf.mxu0 }
  0xeb   :  { %v873_v57 = vadd.f32 %v1279_v54, %v1810_v52 }
  0xec   :  { %v1281_v58 = vpop.f32.mrf.mxu0 }
  0xed   :  { %v1282_v59 = vadd.f32 %v1281_v58, %v1280_v56  ;;  %v933_v61 = vmax.f32 %v873_v57, 0.0 }
  0xee   :  { %v1283_v62 = vpop.f32.mrf.mxu0 }
  0xef   :  { %v948_v63 = vpack.c.bf16 %v933_v61, %v932_v60  ;;  %v878_v1 = vadd.f32 %v1282_v59, %v1810_v52 }
  0xf0   :  { %v1284_v0 = vpop.f32.mrf.mxu0 }
  0xf1   :  { %v1285_v2 = vadd.f32 %v1284_v0, %v1283_v62  ;;  %1363 = vmatprep.mubr.bf16.mxu1 %v948_v63  ;;  %v934_v6 = vmax.f32 %v878_v1, 0.0 }
  0xf2   :  { %v1286_v3 = vpop.f32.mrf.mxu0 }
  0xf3   :  { %v881_v4 = vadd.f32 %v1285_v2, %v1810_v52 }
  0xf4   :  { %v1287_v5 = vpop.f32.mrf.mxu0 }
  0xf5   :  { %v935_v7 = vmax.f32 %v881_v4, 0.0  ;;  %v1288_v8 = vadd.f32 %v1287_v5, %v1286_v3 }
  0xf6   :  { %v1289_v9 = vpop.f32.mrf.mxu0 }
  0xf7   :  { %v949_v10 = vpack.c.bf16 %v935_v7, %v934_v6  ;;  %v886_v12 = vadd.f32 %v1288_v8, %v1810_v52 }
  0xf8   :  { %v1290_v11 = vpop.f32.mrf.mxu0 }
  0xf9   :  { %v1291_v13 = vadd.f32 %v1290_v11, %v1289_v9  ;;  %1364 = vmatmul.mubr.bf16.vlgmr.msra.gmra.mxu1 %v949_v10  ;;  %v936_v18 = vmax.f32 %v886_v12, 0.0  ;;  %v1431_v10 = vmov 0.0   ;;  %v1833_v12 = vld [vmem:[%s1886_s4] ss:$0 sm:$0xff] }
  0xfa   :  { %v1292_v14 = vpop.f32.mrf.mxu0  ;;  %1379 = vmatprep.subr.bf16.mxu0 %v1431_v10  ;;  %1395 = vmatprep.mubr.msk.bf16.mxu0 %vm1432_vm0, %v1431_v10 }
  0xfb   :  { %v889_v15 = vadd.f32 %v1291_v13, %v1810_v52 }
  0xfc   :  { %v1293_v17 = vpop.f32.mrf.mxu0 }
  0xfd   :  { %v937_v19 = vmax.f32 %v889_v15, 0.0  ;;  %v1294_v20 = vadd.f32 %v1293_v17, %v1292_v14 }
  0xfe   :  { %v1295_v21 = vpop.f32.mrf.mxu0 }
  0xff   :  { %v950_v22 = vpack.c.bf16 %v937_v19, %v936_v18  ;;  %v894_v24 = vadd.f32 %v1294_v20, %v1810_v52 }
 0x100   :  { %v1296_v23 = vpop.f32.mrf.mxu0 }
 0x101   :  { %v1297_v25 = vadd.f32 %v1296_v23, %v1295_v21  ;;  %1367 = vmatprep.mubr.bf16.mxu1 %v950_v22  ;;  %v938_v29 = vmax.f32 %v894_v24, 0.0 }
 0x102   :  { %v1298_v26 = vpop.f32.mrf.mxu0 }
 0x103   :  { %v897_v27 = vadd.f32 %v1297_v25, %v1810_v52 }
 0x104   :  { %v1299_v28 = vpop.f32.mrf.mxu0 }
 0x105   :  { %v939_v30 = vmax.f32 %v897_v27, 0.0  ;;  %v1300_v31 = vadd.f32 %v1299_v28, %v1298_v26 }
 0x106   :  { %v1301_v32 = vpop.f32.mrf.mxu0 }
 0x107   :  { %v951_v33 = vpack.c.bf16 %v939_v30, %v938_v29  ;;  %v902_v35 = vadd.f32 %v1300_v31, %v1810_v52 }
 0x108   :  { %v1302_v34 = vpop.f32.mrf.mxu0 }
 0x109   :  { %v1303_v36 = vadd.f32 %v1302_v34, %v1301_v32  ;;  %1368 = vmatmul.mubr.bf16.gmra.mxu1 %v951_v33  ;;  %v940_v40 = vmax.f32 %v902_v35, 0.0 }
 0x10a   :  { %v1304_v37 = vpop.f32.mrf.mxu0 }
 0x10b   :  { %v905_v38 = vadd.f32 %v1303_v36, %v1810_v52 }
 0x10c   :  { %v1305_v39 = vpop.f32.mrf.mxu0 }
 0x10d   :  { %v941_v41 = vmax.f32 %v905_v38, 0.0  ;;  %v1306_v42 = vadd.f32 %v1305_v39, %v1304_v37 }
 0x10e   :  { %v1307_v43 = vpop.f32.mrf.mxu0 }
 0x10f   :  { %v952_v44 = vpack.c.bf16 %v941_v41, %v940_v40  ;;  %v910_v46 = vadd.f32 %v1306_v42, %v1810_v52 }
 0x110   :  { %v1308_v45 = vpop.f32.mrf.mxu0 }
 0x111   :  { %v1309_v16 = vadd.f32 %v1308_v45, %v1307_v43  ;;  %1371 = vmatprep.mubr.bf16.mxu1 %v952_v44  ;;  %v942_v50 = vmax.f32 %v910_v46, 0.0 }
 0x112   :  { %v1310_v47 = vpop.f32.mrf.mxu0 }
 0x113   :  { %v913_v48 = vadd.f32 %v1309_v16, %v1810_v52 }
 0x114   :  { %v1311_v49 = vpop.f32.mrf.mxu0 }
 0x115   :  { %v943_v51 = vmax.f32 %v913_v48, 0.0  ;;  %v1312_v53 = vadd.f32 %v1311_v49, %v1310_v47 }
 0x116   :  { %v1313_v54 = vpop.f32.mrf.mxu0 }
 0x117   :  { %v953_v55 = vpack.c.bf16 %v943_v51, %v942_v50  ;;  %v918_v57 = vadd.f32 %v1312_v53, %v1810_v52 }
 0x118   :  { %v1314_v56 = vpop.f32.mrf.mxu0 }
 0x119   :  { %v1315_v58 = vadd.f32 %v1314_v56, %v1313_v54  ;;  %1372 = vmatmul.mubr.bf16.gmra.mxu1 %v953_v55  ;;  %v944_v62 = vmax.f32 %v918_v57, 0.0 }
 0x11a   :  { %v1316_v59 = vpop.f32.mrf.mxu0 }
 0x11b   :  { %v921_v60 = vadd.f32 %v1315_v58, %v1810_v52 }
 0x11c   :  { %v1317_v61 = vpop.f32.mrf.mxu0 }
 0x11d   :  { %v945_v63 = vmax.f32 %v921_v60, 0.0  ;;  %v1318_v0 = vadd.f32 %v1317_v61, %v1316_v59 }
 0x11e   :  { %v1319_v1 = vpop.f32.mrf.mxu0 }
 0x11f   :  { %v954_v2 = vpack.c.bf16 %v945_v63, %v944_v62  ;;  %v926_v4 = vadd.f32 %v1318_v0, %v1810_v52 }
 0x120   :  { %v1320_v3 = vpop.f32.mrf.mxu0 }
 0x121   :  { %v1321_v5 = vadd.f32 %v1320_v3, %v1319_v1  ;;  %1375 = vmatprep.mubr.bf16.mxu1 %v954_v2  ;;  %v946_v7 = vmax.f32 %v926_v4, 0.0 }
 0x123   :  { %v929_v6 = vadd.f32 %v1321_v5, %v1810_v52 }
 0x125   :  { %v947_v8 = vmax.f32 %v929_v6, 0.0 }
 0x127   :  { %v955_v9 = vpack.c.bf16 %v947_v8, %v946_v7 }
 0x129   :  { %1376 = vmatmul.mubr.bf16.gmra.mxu1 %v955_v9 }
 0x1b9   :  { %v1365_v11 = vpop.f32.mrf.mxu1 }
 0x1ba   :  { %v1070_v14 = vadd.f32 %v1365_v11, %v1833_v12 }
 0x1bb   :  { %v1061_v13 = vpop.f32.mrf.mxu1 }
 0x1bc   :  { %v1062_v15 = vadd.f32 %v1833_v12, %v1061_v13  ;;  %v1126_v19 = vmax.f32 %v1070_v14, 0.0  ;;  %v1140_v13 = vld [vmem:[%s1887_s5] sm:$0xf]  ;;  %v1218_v14 = vstv %s1888_s6 }
 0x1bd   :  { %v1366_v52 = vpop.f32.mrf.mxu1 }
 0x1be   :  { %v1073_v17 = vadd.f32 %v1366_v52, %v1833_v12  ;;  %v1124_v22 = vmax.f32 %v1062_v15, 0.0 }
 0x1bf   :  { %v1064_v18 = vpop.f32.mrf.mxu1 }
 0x1c0   :  { %v1127_v20 = vmax.f32 %v1073_v17, 0.0  ;;  %v1065_v21 = vadd.f32 %v1833_v12, %v1064_v18 }
 0x1c2   :  { %v1839_v23 = vpack.c.bf16 %v1127_v20, %v1126_v19  ;;  %v1125_v24 = vmax.f32 %v1065_v21, 0.0 }
 0x1c4   :  { %v1841_v25 = vpack.c.bf16 %v1125_v24, %v1124_v22  ;;  %v1157_v11 = vsel %vm1149_vm1, %v1839_v23, 0 }
 0x1c9   :  { %v1369_v26 = vpop.f32.mrf.mxu1 }
 0x1ca   :  { %v1086_v62 = vadd.f32 %v1369_v26, %v1833_v12 }
 0x1cb   :  { %v1077_v27 = vpop.f32.mrf.mxu1 }
 0x1cc   :  { %v1130_v1 = vmax.f32 %v1086_v62, 0.0  ;;  %v1078_v4 = vadd.f32 %v1833_v12, %v1077_v27 }
 0x1cd   :  { %v1370_v28 = vpop.f32.mrf.mxu1 }
 0x1ce   :  { %v1089_v60 = vadd.f32 %v1370_v28, %v1833_v12  ;;  %v1128_v7 = vmax.f32 %v1078_v4, 0.0 }
 0x1cf   :  { %v1080_v29 = vpop.f32.mrf.mxu1 }
 0x1d0   :  { %v1131_v63 = vmax.f32 %v1089_v60, 0.0  ;;  %v1081_v3 = vadd.f32 %v1833_v12, %v1080_v29 }
 0x1d2   :  { %v1144_v2 = vpack.c.bf16 %v1131_v63, %v1130_v1  ;;  %v1129_v5 = vmax.f32 %v1081_v3, 0.0 }
 0x1d4   :  { %v1163_v6 = vsel %vm1149_vm1, %v1144_v2, 0  ;;  %v1143_v8 = vpack.c.bf16 %v1129_v5, %v1128_v7 }
 0x1d6   :  { %v1160_v9 = vsel %vm1149_vm1, %v1143_v8, 0 }
 0x1d9   :  { %v1373_v30 = vpop.f32.mrf.mxu1 }
 0x1da   :  { %v1102_v49 = vadd.f32 %v1373_v30, %v1833_v12 }
 0x1db   :  { %v1093_v31 = vpop.f32.mrf.mxu1 }
 0x1dc   :  { %v1134_v53 = vmax.f32 %v1102_v49, 0.0  ;;  %v1094_v56 = vadd.f32 %v1833_v12, %v1093_v31 }
 0x1dd   :  { %v1374_v32 = vpop.f32.mrf.mxu1 }
 0x1de   :  { %v1105_v47 = vadd.f32 %v1374_v32, %v1833_v12  ;;  %v1132_v59 = vmax.f32 %v1094_v56, 0.0 }
 0x1df   :  { %v1096_v33 = vpop.f32.mrf.mxu1 }
 0x1e0   :  { %v1135_v50 = vmax.f32 %v1105_v47, 0.0  ;;  %v1097_v55 = vadd.f32 %v1833_v12, %v1096_v33 }
 0x1e2   :  { %v1146_v54 = vpack.c.bf16 %v1135_v50, %v1134_v53  ;;  %v1133_v57 = vmax.f32 %v1097_v55, 0.0 }
 0x1e4   :  { %v1169_v58 = vsel %vm1149_vm1, %v1146_v54, 0  ;;  %v1145_v61 = vpack.c.bf16 %v1133_v57, %v1132_v59 }
 0x1e6   :  { %v1166_v0 = vsel %vm1149_vm1, %v1145_v61, 0 }
 0x1e9   :  { %v1377_v34 = vpop.f32.mrf.mxu1 }
 0x1ea   :  { %v1118_v36 = vadd.f32 %v1377_v34, %v1833_v12 }
 0x1eb   :  { %v1109_v35 = vpop.f32.mrf.mxu1 }
 0x1ec   :  { %v1138_v40 = vmax.f32 %v1118_v36, 0.0  ;;  %v1110_v43 = vadd.f32 %v1833_v12, %v1109_v35 }
 0x1ed   :  { %v1378_v37 = vpop.f32.mrf.mxu1 }
 0x1ee   :  { %v1121_v38 = vadd.f32 %v1378_v37, %v1833_v12  ;;  %v1136_v16 = vmax.f32 %v1110_v43, 0.0 }
 0x1ef   :  { %v1112_v39 = vpop.f32.mrf.mxu1 }
 0x1f0   :  { %v1139_v41 = vmax.f32 %v1121_v38, 0.0  ;;  %v1113_v42 = vadd.f32 %v1833_v12, %v1112_v39  ;;  %v1154_v12 = vsel %vm1149_vm1, %v1841_v25, 0 }
 0x1f2   :  { %v1148_v44 = vpack.c.bf16 %v1139_v41, %v1138_v40  ;;  %v1137_v45 = vmax.f32 %v1113_v42, 0.0 }
 0x1f4   :  { %v1175_v46 = vsel %vm1149_vm1, %v1148_v44, 0  ;;  %v1147_v48 = vpack.c.bf16 %v1137_v45, %v1136_v16 }
 0x1f5   :  { %1380 = vmatpush3.bf16.xpose.msra.mxu0 %v1175_v46 }
 0x1f6   :  { %1381 = vmatprep.subr.bf16.mxu0 %v1431_v10  ;;  %v1172_v51 = vsel %vm1149_vm1, %v1147_v48, 0 }
 0x1fd   :  { %1382 = vmatpush3.bf16.xpose.msra.mxu0 %v1172_v51 }
 0x1fe   :  { %1383 = vmatprep.subr.bf16.mxu0 %v1431_v10 }
 0x205   :  { %1384 = vmatpush3.bf16.xpose.msra.mxu0 %v1169_v58 }
 0x206   :  { %1385 = vmatprep.subr.bf16.mxu0 %v1431_v10 }
 0x20d   :  { %1386 = vmatpush3.bf16.xpose.msra.mxu0 %v1166_v0 }
 0x20e   :  { %1387 = vmatprep.subr.bf16.mxu0 %v1431_v10 }
 0x215   :  { %1388 = vmatpush3.bf16.xpose.msra.mxu0 %v1163_v6 }
 0x216   :  { %1389 = vmatprep.subr.bf16.mxu0 %v1431_v10 }
 0x21d   :  { %1390 = vmatpush3.bf16.xpose.msra.mxu0 %v1160_v9 }
 0x21e   :  { %1391 = vmatprep.subr.bf16.mxu0 %v1431_v10 }
 0x225   :  { %1392 = vmatpush3.bf16.xpose.msra.mxu0 %v1157_v11 }
 0x226   :  { %1393 = vmatprep.subr.bf16.mxu0 %v1431_v10 }
 0x22d   :  { %1394 = vmatpush3.bf16.xpose.msra.mxu0 %v1154_v12 }
 0x234   :  { %1396 = vmatmul.mubr.msk.bf16.vlgmr.msra.gmra.mxu0 %vm1149_vm1, %v1140_v13 }
 0x2f4   :  { %v1211_v52 = vpop.f32.mrf.mxu0 }
 0x2f5   :  { %v1219_v15 = vadd.f32 %v1218_v14, %v1211_v52 }
 0x2f6   :  { %v1397_v17 = vpop.f32.mrf.mxu0 }
 0x2f7   :  { %v1220_v18 = vsub.f32 0.0, %v1219_v15 }
 0x2f8   :  { %v1214_v19 = vpop.f32.mrf.mxu0 }
 0x2f9   :  { %v1221_v10 = vmul.f32 1.442695, %v1220_v18 }
 0x2fa   :  { %v1398_v20 = vpop.f32.mrf.mxu0 }
 0x2fb   :  { %1426 = vpow2.f32 %v1221_v10 }
 0x308   :  { %v1427_v21 = vpop.eup %1426 }
 0x309   :  { %v1223_v22 = vadd.f32 1.0, %v1427_v21 }
 0x30b   :  { %1428 = vrcp.f32 %v1223_v22 }
 0x318   :  { %v1429_v23 = vpop.eup %1428 }
 0x319   :  { %1226 = vst [vmem:[%s1889_s7] sm:$0x1] %v1429_v23 }

</bundles_post_ra>
